<compile_context>
chip_gen: v7x
topology: tpu7x:2x2x1
jax: 0.10.0
libtpu: 0.0.40
codegen_flags: <defaults>
</compile_context>

<pallas_src>
import functools

import jax
import jax.numpy as jnp
from jax.experimental import pallas as pl
from jax.experimental.pallas import tpu as pltpu


# --------------------------------------------------------------------------- #
# Shared tile math
# --------------------------------------------------------------------------- #
def _focal_weight(w, gamma):
    """(1 - pt) ** gamma.  Integer gamma -> repeated VPU multiplies (keeps the
    single EUP slot free for the log-sum-exp exp/log); fractional gamma -> pow
    with a clamp so (tiny negative)**frac never produces NaN."""
    g_is_int = isinstance(gamma, int) or (
        isinstance(gamma, float) and float(gamma).is_integer()
    )
    if g_is_int and 0 <= int(gamma) <= 8:
        g = int(gamma)
        if g == 0:
            return jnp.ones_like(w)
        out = w
        for _ in range(g - 1):
            out = out * w
        return out
    return jnp.power(jnp.maximum(w, 0.0), gamma)


def _ce_and_focal(x, t, alpha, gamma):
    """Per-row focal loss for one tile.

    x: (TN, C) logits in their native dtype (f32 or bf16).  The bulk (TN, C)
    work (row max, one-hot gather of x_t) stays in that dtype; only the
    exp/log-sum-exp runs in f32.  t: (TN, 1) int32.  Returns (TN, 1) f32.
    """
    m = jnp.max(x, axis=-1, keepdims=True)                        # (TN, 1) native
    cls = jax.lax.broadcasted_iota(jnp.int32, x.shape, 1)
    # gather x[target] via one-hot select (no dynamic gather on TPU); the sum has
    # a single non-zero element per row so it is exact in any dtype.
    x_t = jnp.sum(jnp.where(cls == t, x, jnp.zeros_like(x)),
                  axis=-1, keepdims=True)                         # (TN, 1) native
    z = (x - m).astype(jnp.float32)                               # <= 0, no overflow
    lse = jnp.log(jnp.sum(jnp.exp(z), axis=-1, keepdims=True))    # (TN, 1) f32
    # ce = logsumexp(x) - x_t  (CrossEntropyLoss(reduction='none'))
    ce = m.astype(jnp.float32) + lse - x_t.astype(jnp.float32)
    pt = jnp.exp(-ce)
    return alpha * _focal_weight(1.0 - pt, gamma) * ce            # (TN, 1) f32


# --------------------------------------------------------------------------- #
# Kernels
# --------------------------------------------------------------------------- #
def _focal_reduce_kernel(logits_ref, tgt_ref, out_ref, acc_ref, *,
                         alpha, gamma, n_valid, tile_rows, tiles_per_core,
                         mask_rows):
    """grid = (n_split, tiles_per_core); outer axis 'parallel' (one chunk per
    TensorCore on v7x), inner axis 'arbitrary' (per-core accumulation)."""
    i = pl.program_id(1)

    @pl.when(i == 0)
    def _():
        acc_ref[...] = jnp.zeros_like(acc_ref)

    f = _ce_and_focal(logits_ref[...], tgt_ref[...], alpha, gamma)   # (TN, 1)

    if mask_rows:
        # Ragged last tile (rows >= N read garbage) and/or phantom tile on an odd
        # split (index_map clamps to the last real tile): zero those rows.  Tiny
        # (TN, 1) work, free filler while the bulk (TN, C) path is the bottleneck.
        vtile = pl.program_id(0) * tiles_per_core + i                # un-clamped
        row = jax.lax.broadcasted_iota(jnp.int32, f.shape, 0) + vtile * tile_rows
        f = jnp.where(row < n_valid, f, 0.0)

    # Vector accumulator: elementwise add per step; the cross-sublane reduction
    # happens once, in the epilogue.
    acc_ref[...] = acc_ref[...] + f

    @pl.when(i == pl.num_programs(1) - 1)
    def _():
        # Per-core partial sum, broadcast over an (8, 128)-aligned output block.
        # The wrapper combines the partials and divides by the true N.
        out_ref[...] = jnp.full(out_ref.shape, jnp.sum(acc_ref[...]), jnp.float32)


def _focal_noreduce_kernel(logits_ref, tgt_ref, out_ref, *, alpha, gamma):
    f = _ce_and_focal(logits_ref[...], tgt_ref[...], alpha, gamma)
    out_ref[...] = f.astype(out_ref.dtype)


# --------------------------------------------------------------------------- #
# Wrapper / tiling heuristics
# --------------------------------------------------------------------------- #
def _vmem_params():
    """(tile budget bytes, vmem_limit_bytes), generation-aware.

    v5e/v6e have 128 MiB physical VMEM -> be generous; v7x has only 64 MiB
    (32 MiB scoped default) -> stay conservative.  Unknown -> v7x-safe numbers.
    """
    try:
        cap = getattr(pltpu.get_tpu_info(), "vmem_capacity_bytes", None)
    except Exception:  # not on TPU / API unavailable
        cap = None
    if cap is not None and cap >= 96 * 1024 * 1024:       # v5e / v6e (128 MiB)
        return 40 * 1024 * 1024, 64 * 1024 * 1024
    return 20 * 1024 * 1024, 32 * 1024 * 1024             # v7x (64 MiB) / unknown


def _pick_tile_rows(n, c, itemsize, sublane, vmem_budget_bytes, max_rows=8192):
    """Largest batch tile under the VMEM budget.

    Per row: logits c*itemsize bytes (double-buffered) + (TN,1) i32 targets
    lane-padded to 128 lanes = 512 B (double-buffered) + (TN,1) f32 accumulator
    scratch (single).  max_rows=8192 keeps >=1 MiB per grid step even for small C
    so the ~0.35 us/step overhead stays amortized.
    """
    per_row = 2 * c * itemsize + 2 * 512 + 512
    rows = vmem_budget_bytes // per_row
    rows = max(sublane, min(max_rows, rows))
    rows = (rows // sublane) * sublane
    n_rounded = -(-n // sublane) * sublane
    return max(sublane, min(rows, n_rounded))


def focal_loss(logits, targets, *, alpha=0.25, gamma=2, reduce=True,
               tile_rows=None):
    """Pallas implementation of FocalLoss.forward.

    logits:  (N, C) float32 or bfloat16
    targets: (N,)   integer class indices
    Returns scalar mean (reduce=True) or per-sample loss (N,) (reduce=False).
    """
    N, C = logits.shape
    itemsize = jnp.dtype(logits.dtype).itemsize
    sublane = max(8, 32 // itemsize)          # 8 for f32, 16 for bf16, 32 for int8
    vmem_budget, vmem_limit = _vmem_params()

    if tile_rows is None:
        tile_rows = _pick_tile_rows(N, C, itemsize, sublane, vmem_budget)
    assert tile_rows % sublane == 0, (tile_rows, sublane)

    num_tiles = -(-N // tile_rows)            # no jnp.pad: ragged last block is OK
    tgt2d = targets.astype(jnp.int32).reshape(N, 1)
    # TODO(synk): pass targets lane-dense as (1, N) blocks (with one in-kernel
    # i32 relayout) to drop the 512 B/row lane-padding from the VMEM budget.

    if reduce:
        # Split whole tiles across (up to) 2 TensorCores; harmless on 1-TC chips.
        n_split = 2 if num_tiles >= 2 else 1
        tiles_per_core = -(-num_tiles // n_split)
        phantom = (n_split * tiles_per_core != num_tiles)
        last_tile = num_tiles - 1
        mask_rows = (N % tile_rows != 0) or phantom

        def in_index(c, i):
            t = c * tiles_per_core + i
            if phantom:
                t = jnp.minimum(t, last_tile)   # phantom tile re-reads last tile
            return (t, 0)

        kernel = functools.partial(
            _focal_reduce_kernel, alpha=float(alpha), gamma=gamma,
            n_valid=N, tile_rows=tile_rows, tiles_per_core=tiles_per_core,
            mask_rows=mask_rows)

        out = pl.pallas_call(
            kernel,
            out_shape=jax.ShapeDtypeStruct((n_split * 8, 128), jnp.float32),
            grid=(n_split, tiles_per_core),
            in_specs=[
                pl.BlockSpec((tile_rows, C), in_index),
                pl.BlockSpec((tile_rows, 1), in_index),
            ],
            out_specs=pl.BlockSpec((8, 128), lambda c, i: (c, 0)),
            scratch_shapes=[pltpu.VMEM((tile_rows, 1), jnp.float32)],
            compiler_params=pltpu.CompilerParams(
                dimension_semantics=("parallel", "arbitrary"),
                vmem_limit_bytes=vmem_limit),
        )(logits, tgt2d)

        partials = out[::8, 0]                     # one partial per core chunk
        return jnp.sum(partials) * (1.0 / N)       # mean over the true N
    else:
        kernel = functools.partial(
            _focal_noreduce_kernel, alpha=float(alpha), gamma=gamma)
        out = pl.pallas_call(
            kernel,
            out_shape=jax.ShapeDtypeStruct((N, 1), jnp.float32),
            grid=(num_tiles,),
            in_specs=[
                pl.BlockSpec((tile_rows, C), lambda i: (i, 0)),
                pl.BlockSpec((tile_rows, 1), lambda i: (i, 0)),
            ],
            out_specs=pl.BlockSpec((tile_rows, 1), lambda i: (i, 0)),
            compiler_params=pltpu.CompilerParams(
                dimension_semantics=("parallel",),
                vmem_limit_bytes=vmem_limit),
        )(logits, tgt2d)
        # Out-of-range rows of the ragged last block are discarded on write.
        # TODO(synk): emit a lane-dense (num_tiles, tile_rows) output (one in-kernel
        # (TN,1)->(1,TN) relayout per tile) once that relayout is guaranteed to
        # lower; output traffic here is only 1/C of the input so it is deferred.
        return out[:, 0]


# --------------------------------------------------------------------------- #
# Reference + tests
# --------------------------------------------------------------------------- #
def _focal_loss_ref(logits, targets, *, alpha=0.25, gamma=2, reduce=True):
    """Pure-JAX reference mirroring the PyTorch module."""
    logp = jax.nn.log_softmax(logits.astype(jnp.float32), axis=-1)
    ce = -jnp.take_along_axis(logp, targets[:, None].astype(jnp.int32), axis=-1)[:, 0]
    pt = jnp.exp(-ce)
    f = alpha * (1.0 - pt) ** gamma * ce
    return jnp.mean(f) if reduce else f


if __name__ == "__main__":
    key = jax.random.PRNGKey(0)
    k1, k2, k3, k4, k5, k6 = jax.random.split(key, 6)

    # Case 1: single-tile path (batch=8, classes=32), both reduce modes.
    N, C = 8, 32
    logits = jax.random.normal(k1, (N, C), dtype=jnp.float32)
    targets = jax.random.randint(k2, (N,), 0, C, dtype=jnp.int32)

    loss = jax.block_until_ready(focal_loss(logits, targets, alpha=0.25, gamma=2))
    ref = _focal_loss_ref(logits, targets, alpha=0.25, gamma=2)
    assert jnp.allclose(loss, ref, rtol=1e-5, atol=1e-6), (loss, ref)

    loss_vec = jax.block_until_ready(
        focal_loss(logits, targets, alpha=0.25, gamma=2, reduce=False))
    ref_vec = _focal_loss_ref(logits, targets, alpha=0.25, gamma=2, reduce=False)
    assert jnp.allclose(loss_vec, ref_vec, rtol=1e-5, atol=1e-6)

    # Case 2: multi-tile grid with a ragged last tile and an odd tile count
    # (batch=20, tile_rows=8 -> 3 tiles -> 2-way core split with one phantom
    # tile), exercising accumulator init/finalize, clamped index_map and masking.
    N2, C2 = 20, 32
    logits2 = jax.random.normal(k3, (N2, C2), dtype=jnp.float32)
    targets2 = jax.random.randint(k4, (N2,), 0, C2, dtype=jnp.int32)

    loss2 = jax.block_until_ready(focal_loss(logits2, targets2, tile_rows=8))
    ref2 = _focal_loss_ref(logits2, targets2)
    assert jnp.allclose(loss2, ref2, rtol=1e-5, atol=1e-6), (loss2, ref2)

    loss2_vec = jax.block_until_ready(
        focal_loss(logits2, targets2, reduce=False, tile_rows=8))
    ref2_vec = _focal_loss_ref(logits2, targets2, reduce=False)
    assert jnp.allclose(loss2_vec, ref2_vec, rtol=1e-5, atol=1e-6)

    # Case 3: bf16 logits (16-row sublane tiles, native-dtype bulk math) with a
    # ragged last tile (batch=24, tile_rows=16 -> 2 tiles, one per core chunk).
    N3, C3 = 24, 32
    logits3 = jax.random.normal(k5, (N3, C3), dtype=jnp.float32).astype(jnp.bfloat16)
    targets3 = jax.random.randint(k6, (N3,), 0, C3, dtype=jnp.int32)

    loss3 = jax.block_until_ready(focal_loss(logits3, targets3, tile_rows=16))
    ref3 = _focal_loss_ref(logits3, targets3)
    assert jnp.allclose(loss3, ref3, rtol=5e-2, atol=1e-3), (loss3, ref3)

    loss3_vec = jax.block_until_ready(
        focal_loss(logits3, targets3, reduce=False, tile_rows=16))
    ref3_vec = _focal_loss_ref(logits3, targets3, reduce=False)
    assert jnp.allclose(loss3_vec, ref3_vec, rtol=5e-2, atol=1e-3)

    print("KERNEL_OK")
</pallas_src>

<mosaic_0001>
module attributes {stable_mosaic.version = 11 : i64} {
  func.func @_focal_reduce_kernel(%arg0: i32, %arg1: i32, %arg2: memref<8x32xf32, #tpu.memory_space<vmem>>, %arg3: memref<8x1xi32, #tpu.memory_space<vmem>>, %arg4: memref<8x128xf32, #tpu.memory_space<vmem>>, %arg5: memref<8x1xf32, #tpu.memory_space<vmem>>) attributes {dimension_semantics = [#tpu.dimension_semantics<parallel>, #tpu.dimension_semantics<arbitrary>], iteration_bounds = array<i64: 1, 1>, scalar_prefetch = 0 : i64, scratch_operands = 1 : i64, tpu.core_type = #tpu.core_type<tc>, window_params = [{transform_indices = @transform_0, window_bounds = array<i64: 8, 32>}, {transform_indices = @transform_1, window_bounds = array<i64: 8, 1>}, {transform_indices = @transform_2, window_bounds = array<i64: 8, 128>}]} {
    %c0_i32 = arith.constant 0 : i32
    %0 = arith.cmpi eq, %arg1, %c0_i32 : i32
    %1 = arith.extui %0 : i1 to i32
    %c0_i32_0 = arith.constant 0 : i32
    %2 = arith.cmpi ne, %1, %c0_i32_0 : i32
    scf.if %2 {
      %cst_16 = arith.constant 0.000000e+00 : f32
      %37 = vector.broadcast %cst_16 : f32 to vector<8x1xf32>
      %c0_17 = arith.constant 0 : index
      %c0_18 = arith.constant 0 : index
      %38 = vector.load %arg5[%c0_17, %c0_18] : memref<8x1xf32, #tpu.memory_space<vmem>>, vector<8x1xf32>
      tpu.vector_store %arg5[%c0_17, %c0_18], %37 {strides = array<i32>} : memref<8x1xf32, #tpu.memory_space<vmem>>, vector<8x1xf32>,
    } else {
    }
    %c0 = arith.constant 0 : index
    %c0_1 = arith.constant 0 : index
    %3 = vector.load %arg2[%c0, %c0_1] : memref<8x32xf32, #tpu.memory_space<vmem>>, vector<8x32xf32>
    %c0_2 = arith.constant 0 : index
    %c0_3 = arith.constant 0 : index
    %4 = vector.load %arg3[%c0_2, %c0_3] : memref<8x1xi32, #tpu.memory_space<vmem>>, vector<8x1xi32>
    %cst = arith.constant dense<0xFF800000> : vector<8xf32>
    %5 = vector.multi_reduction <maximumf>, %3, %cst [1] : vector<8x32xf32> to vector<8xf32>
    %6 = vector.shape_cast %5 : vector<8xf32> to vector<8x1xf32>
    %7 = tpu.iota {dimensions = array<i32: 1>} : vector<8x32xi32>
    %8 = vector.broadcast %4 : vector<8x1xi32> to vector<8x32xi32>
    %9 = arith.cmpi eq, %7, %8 : vector<8x32xi32>
    %cst_4 = arith.constant 0.000000e+00 : f32
    %10 = vector.broadcast %cst_4 : f32 to vector<8x32xf32>
    %11 = arith.select %9, %3, %10 : vector<8x32xi1>, vector<8x32xf32>
    %cst_5 = arith.constant dense<0.000000e+00> : vector<8xf32>
    %12 = vector.multi_reduction <add>, %11, %cst_5 [1] : vector<8x32xf32> to vector<8xf32>
    %13 = vector.shape_cast %12 : vector<8xf32> to vector<8x1xf32>
    %14 = vector.broadcast %6 : vector<8x1xf32> to vector<8x32xf32>
    %15 = arith.subf %3, %14 : vector<8x32xf32>
    %16 = math.exp %15 : vector<8x32xf32>
    %cst_6 = arith.constant dense<0.000000e+00> : vector<8xf32>
    %17 = vector.multi_reduction <add>, %16, %cst_6 [1] : vector<8x32xf32> to vector<8xf32>
    %18 = vector.shape_cast %17 : vector<8xf32> to vector<8x1xf32>
    %19 = math.log %18 : vector<8x1xf32>
    %20 = arith.addf %6, %19 : vector<8x1xf32>
    %21 = arith.subf %20, %13 : vector<8x1xf32>
    %cst_7 = arith.constant 0.000000e+00 : f32
    %22 = vector.broadcast %cst_7 : f32 to vector<8x1xf32>
    %23 = arith.subf %22, %21 : vector<8x1xf32>
    %24 = math.exp %23 : vector<8x1xf32>
    %cst_8 = arith.constant 1.000000e+00 : f32
    %25 = vector.broadcast %cst_8 : f32 to vector<8x1xf32>
    %26 = arith.subf %25, %24 : vector<8x1xf32>
    %27 = arith.mulf %26, %26 : vector<8x1xf32>
    %cst_9 = arith.constant 2.500000e-01 : f32
    %28 = vector.broadcast %cst_9 : f32 to vector<8x1xf32>
    %29 = arith.mulf %28, %27 : vector<8x1xf32>
    %30 = arith.mulf %29, %21 : vector<8x1xf32>
    %c0_10 = arith.constant 0 : index
    %c0_11 = arith.constant 0 : index
    %31 = vector.load %arg5[%c0_10, %c0_11] : memref<8x1xf32, #tpu.memory_space<vmem>>, vector<8x1xf32>
    %32 = arith.addf %31, %30 : vector<8x1xf32>
    %c0_12 = arith.constant 0 : index
    %c0_13 = arith.constant 0 : index
    %33 = vector.load %arg5[%c0_12, %c0_13] : memref<8x1xf32, #tpu.memory_space<vmem>>, vector<8x1xf32>
    tpu.vector_store %arg5[%c0_12, %c0_13], %32 {strides = array<i32>} : memref<8x1xf32, #tpu.memory_space<vmem>>, vector<8x1xf32>,
    %c0_i32_14 = arith.constant 0 : i32
    %34 = arith.cmpi eq, %arg1, %c0_i32_14 : i32
    %35 = arith.extui %34 : i1 to i32
    %c0_i32_15 = arith.constant 0 : i32
    %36 = arith.cmpi ne, %35, %c0_i32_15 : i32
    scf.if %36 {
      %c0_16 = arith.constant 0 : index
      %c0_17 = arith.constant 0 : index
      %37 = vector.load %arg5[%c0_16, %c0_17] : memref<8x1xf32, #tpu.memory_space<vmem>>, vector<8x1xf32>
      %38 = vector.shape_cast %37 : vector<8x1xf32> to vector<1x8x1xf32>
      %cst_18 = arith.constant dense<0.000000e+00> : vector<1xf32>
      %39 = vector.multi_reduction <add>, %38, %cst_18 [1, 2] : vector<1x8x1xf32> to vector<1xf32>
      %40 = vector.shape_cast %39 : vector<1xf32> to vector<1x1x1xf32>
      %41 = vector.extract %40[0, 0, 0] : f32 from vector<1x1x1xf32>
      %42 = vector.broadcast %41 : f32 to vector<8x128xf32>
      %c0_19 = arith.constant 0 : index
      %c0_20 = arith.constant 0 : index
      %43 = vector.load %arg4[%c0_19, %c0_20] : memref<8x128xf32, #tpu.memory_space<vmem>>, vector<8x128xf32>
      tpu.vector_store %arg4[%c0_19, %c0_20], %42 {strides = array<i32>} : memref<8x128xf32, #tpu.memory_space<vmem>>, vector<8x128xf32>,
    } else {
    }
    return
  }
  func.func @transform_0(%arg0: i32, %arg1: i32) -> (i32, i32) {
    %c1_i32 = arith.constant 1 : i32
    %0 = arith.muli %arg0, %c1_i32 : i32
    %1 = arith.addi %0, %arg1 : i32
    %c0_i32 = arith.constant 0 : i32
    %c0_i32_0 = arith.constant 0 : i32
    return %1, %c0_i32 : i32, i32
  }
  func.func @transform_1(%arg0: i32, %arg1: i32) -> (i32, i32) {
    %c1_i32 = arith.constant 1 : i32
    %0 = arith.muli %arg0, %c1_i32 : i32
    %1 = arith.addi %0, %arg1 : i32
    %c0_i32 = arith.constant 0 : i32
    %c0_i32_0 = arith.constant 0 : i32
    return %1, %c0_i32 : i32, i32
  }
  func.func @transform_2(%arg0: i32, %arg1: i32) -> (i32, i32) {
    %c0_i32 = arith.constant 0 : i32
    %c0_i32_0 = arith.constant 0 : i32
    return %arg0, %c0_i32 : i32, i32
  }
}

</mosaic_0001>

<bundles_post_ra>
// kernel: tpu_custom_call.1
= control target key start
LH: loop header
LB: loop body
LE: loop exit
PB: predicated region body
PF: predicated region fallthrough
CT: control target
= control target key end

     0   :  { %vm54_vm0 = vcmask 261120   ;;  %s209_s0 = inlined_call_operand.vmem [shape: f32[8,32], index: 0, kind: input, shape index: {}]   ;;  %s210_s1 = inlined_call_operand.vmem [shape: s32[8,1], index: 1, kind: input, shape index: {}]   ;;  %s211_s2 = inlined_call_operand.hbm [shape: f32[8,128], index: 2, kind: output, shape index: {}]  }
   0x1   :  { %v52_v0 = vld [vmem:[%s209_s0] sm:$0xff] }
   0x2   :  { %7 = vsyncpa [#allocation4], 0  ;;  %v55_v1 = vsel %vm54_vm0, %v52_v0, -inf  ;;  %v167_v2 = vmov 0   ;;  %v53_v3 = vld [vmem:[%s210_s1] sm:$0xff]  ;;  %v58_v7 = vlaneseq  ;;  %vm50_vm2 = vcmask 7168  }
   0x3   :  { %136 = vset.pattern.permute.xlu0 %v167_v2  ;;  %v168_v14 = vmov 0.0   ;;  %s169_s0 = smov [#allocation3]  }
   0x4   :  { %56 = vmax.xlane.f32.xlu0 %v55_v1  ;;  %v59_v8 = vand.u32 127, %v58_v7  ;;  %51 = vst.msk [vmem:[#allocation2] sm:$0xff] %vm50_vm2, %v168_v14  ;;  %s111_s1 = sshll.u32 %s169_s0, 4  ;;  %s112_s1 = int_to_ptr.vmem [resolvable:$true] %s111_s1 }
   0x5   :  { %s143_s14 = scalar_lea.vmem %s112_s1, 128  ;;  %p148_p1 = scmp.lt.s32.totalorder %s112_s1, %s112_s1 }
   0x6   :  { %p144_p0 = scmp.ne.s32.totalorder %s112_s1, %s143_s14  ;;  %p149_p2 = scmp.lt.s32.totalorder %s143_s14, %s143_s14 }
   0x8   :  { %p150_p3 = por %p149_p2, %p148_p1 }
   0xa   :  { %p151_p4 = pnand %p150_p3, %p144_p0 }
   0xb   :  { %v85_v27 = vld [vmem:[#allocation2] sm:$0xff] }
  0x1a   :  { %61 = vperm.xlu0 %136, %v53_v3  }
  0x91   :  { %v57_v4 = vpop.xlane.xlu0 %56 }
  0x92   :  { %v68_v5 = vsub.f32 %v52_v0, %v57_v4 }
  0x94   :  { %v69_v6 = vmul.f32 1.442695, %v68_v5 }
  0x96   :  { %137 = vpow2.f32 %v69_v6 }
  0x99   :  { %v62_v9 = vpop.permute.xlu0 %61 }
  0x9a   :  { %vm63_vm1 = vcmp.eq.s32.totalorder %v59_v8, %v62_v9 }
  0x9b   :  { %v64_v11 = vsel %vm63_vm1, %v52_v0, 0.0 }
  0x9c   :  { %v65_v13 = vsel %vm54_vm0, %v64_v11, 0.0 }
  0xa0   :  { %v138_v10 = vpop.eup %137 }
  0xa1   :  { %v71_v12 = vsel %vm54_vm0, %v138_v10, 0.0 }
  0xa2   :  { %72 = vadd.xlane.f32.xlu1 %v71_v12 }
  0xa6   :  { %66 = vadd.xlane.f32.xlu1 %v65_v13 }
 0x12f   :  { %v73_v15 = vpop.xlane.xlu1 %72 }
 0x130   :  { %139 = vlog2.f32 %v73_v15 }
 0x133   :  { %v67_v18 = vpop.xlane.xlu1 %66 }
 0x13a   :  { %v140_v16 = vpop.eup %139 }
 0x13b   :  { %v75_v17 = vmul.f32 0.6931472, %v140_v16 }
 0x13d   :  { %v76_v19 = vadd.f32 %v75_v17, %v57_v4 }
 0x13f   :  { %v77_v20 = vsub.f32 %v76_v19, %v67_v18 }
 0x141   :  { %v78_v21 = vsub.f32 0.0, %v77_v20 }
 0x143   :  { %v79_v22 = vmul.f32 1.442695, %v78_v21 }
 0x145   :  { %141 = vpow2.f32 %v79_v22 }
 0x14f   :  { %v142_v23 = vpop.eup %141 }
 0x150   :  { %v81_v24 = vsub.f32 1.0, %v142_v23 }
 0x152   :  { %v82_v25 = vmul.f32 %v81_v24, %v81_v24 }
 0x154   :  { %v83_v26 = vmul.f32 0.25, %v82_v25 }
 0x156   :  { %v84_v28 = vmul.f32 %v83_v26, %v77_v20 }
 0x158   :  { %v86_v29 = vadd.f32 %v85_v27, %v84_v28 }
 0x15a   :  { %88 = vst.msk [vmem:[#allocation2] sm:$0xff] %vm50_vm2, %v86_v29 }
 0x161   :  { %v92_v30 = vld [vmem:[#allocation2] sm:$0xff] }
 0x162   :  { %v93_v31 = vsel %vm50_vm2, %v92_v30, 0.0 }
 0x163   :  { %94 = vadd.xlane.f32.xlu1 %v93_v31 }
 0x1f0   :  { %v95_v32 = vpop.xlane.xlu1 %94 }
 0x1f1   :  { %v96_v33 = vrot.slane %v95_v32, 4 }
 0x1f3   :  { %v97_v34 = vadd.f32 %v96_v33, %v95_v32 }
 0x1f5   :  { %v98_v35 = vrot.slane %v97_v34, 2 }
 0x1f7   :  { %v99_v36 = vadd.f32 %v98_v35, %v97_v34 }
 0x1f9   :  { %v100_v37 = vrot.slane %v99_v36, 1 }
 0x1fb   :  { %v101_v38 = vadd.f32 %v100_v37, %v99_v36 }
 0x1fd   :  { %131 = vpush %v101_v38 }
 0x22e   :  { %s132_s13 = spop %131 }
 0x22f   :  { %v103_v39 = vstv %s132_s13 }
 0x230   :  { %104 = vst [vmem:[#allocation3] sm:$0xff] %v103_v39 }
 0x231   :  { %154 = shalt.err (!%p151_p4)
}
 0x232   :  { %s155_s17 = scalar_lea.hbm %s211_s2, 128 }
 0x233   :  { %p156_p5 = scmp.ne.s32.totalorder %s211_s2, %s155_s17  ;;  %p159_p6 = scmp.lt.u32.totalorder %s155_s17, %s211_s2 }
 0x235   :  { %p161_p7 = pnand %p159_p6, %p156_p5 }
 0x237   :  { %164 = shalt.err (!%p161_p7)
}
 0x238   :  { %114 = dma.vmem_to_hbm [thread:$0]  %s112_s1, 128, %s211_s2, [#allocation4]  }
 0x239   :  { %165 = dma.done.wait [#allocation4], 128  }
 0x23a   :  { %166 = vsyncadd [#allocation4], 4294967168 }
 0x23b   :  { %118 = vsyncpa [#allocation4], 1 }

</bundles_post_ra>
